<compile_context>
chip_gen: v7x
topology: tpu7x:2x2x1
jax: 0.10.0
libtpu: 0.0.40
codegen_flags: <defaults>
</compile_context>

<pallas_src>
import jax
import jax.numpy as jnp
from jax.experimental import pallas as pl
from jax.experimental.pallas import tpu as pltpu

IN_DIM = 512
HID_DIM = 256
OUT_DIM = 1
TILE_B_MAX = 4096  # max batch rows per grid step (~25 MiB VMEM peak at f32 x)
VMEM_LIMIT_BYTES = 32 * 1024 * 1024  # safe on v5e/v6e/v7x physical VMEM


def _round_up(n, m):
    return ((n + m - 1) // m) * m


def _identity_mlp_kernel(x_ref, w1_ref, b1_ref, w2_ref, b2_ref, o_ref):
    # x: (TILE_B, 512) f32 or bf16, w1: (512, 256) bf16, b1: (1, 256) f32,
    # w2: (1, 256) f32, b2: (1, 1) f32 in SMEM, o: (1, TILE_B) f32.

    # Layer 1: bf16 MXU matmul, f32 accumulate. If x already streams in as
    # bf16 there is no in-kernel cast (trace-time branch).
    x = x_ref[...]
    if x.dtype != jnp.bfloat16:
        x = x.astype(jnp.bfloat16)
    h = jnp.dot(x, w1_ref[...], preferred_element_type=jnp.float32) + b1_ref[...]
    h = jnp.maximum(h, 0.0)  # ReLU in f32 (v5e-safe epilogue)

    # Layer 2: contract w2_row (1, 256) with h (TILE_B, 256) on the feature
    # axis -> (1, TILE_B). Batch lands on the lane axis, so the output store is
    # an unmasked, lane-dense vst.
    y = jax.lax.dot_general(
        w2_ref[...], h,
        (((1,), (1,)), ((), ())),
        preferred_element_type=jnp.float32,
    )
    y = y + b2_ref[0, 0]  # scalar bias from SMEM
    o_ref[...] = jax.nn.sigmoid(y).astype(o_ref.dtype)


def identity_forward(x, w1, b1, w2, b2, *, tile_b=None):
    """Fused MLP forward: sigmoid(relu(x @ w1 + b1) @ w2 + b2) -> (B, 1).

    x may be float32 or bfloat16 (bf16 halves HBM traffic; the kernel is
    bandwidth-bound on the x stream).
    """
    B, in_dim = x.shape
    assert in_dim == IN_DIM, f"expected x[:, {IN_DIM}], got {x.shape}"

    if tile_b is None:
        # Adaptive: keep >=2 grid steps whenever B allows so both v7x
        # TensorCores get work; cap at TILE_B_MAX to stay inside scoped VMEM.
        tile_b = min(TILE_B_MAX, max(128, _round_up(-(-B // 2), 128)))
    assert tile_b % 128 == 0 and tile_b >= 128, (
        "tile_b must be a multiple of 128 (lane dim of the output block / "
        "sublane dim of the x block)")

    num_tiles = pl.cdiv(B, tile_b)
    b_pad = num_tiles * tile_b
    if b_pad != B:
        x = jnp.pad(x, ((0, b_pad - B), (0, 0)))

    # Weights are tiny; pre-shape/cast once outside the kernel.
    w1b = w1.astype(jnp.bfloat16)                        # (512, 256) bf16
    b1r = b1.reshape(1, HID_DIM).astype(jnp.float32)     # (1, 256)
    w2r = w2.reshape(1, HID_DIM).astype(jnp.float32)     # (1, 256) row
    b2r = b2.reshape(1, 1).astype(jnp.float32)           # (1, 1) -> SMEM scalar

    out = pl.pallas_call(
        _identity_mlp_kernel,
        out_shape=jax.ShapeDtypeStruct((num_tiles, 1, tile_b), jnp.float32),
        grid=(num_tiles,),
        in_specs=[
            pl.BlockSpec((tile_b, IN_DIM), lambda i: (i, 0)),    # x: streamed
            pl.BlockSpec((IN_DIM, HID_DIM), lambda i: (0, 0)),   # w1: resident
            pl.BlockSpec((1, HID_DIM), lambda i: (0, 0)),        # b1: resident
            pl.BlockSpec((1, HID_DIM), lambda i: (0, 0)),        # w2: resident
            pl.BlockSpec(memory_space=pltpu.MemorySpace.SMEM),   # b2: SMEM scalar
        ],
        # Lane-dense output: one (1, tile_b) row per grid step.
        out_specs=pl.BlockSpec((None, 1, tile_b), lambda i: (i, 0, 0)),
        compiler_params=pltpu.CompilerParams(
            dimension_semantics=("parallel",),
            vmem_limit_bytes=VMEM_LIMIT_BYTES,
        ),
    )(x, w1b, b1r, w2r, b2r)

    # (num_tiles, 1, tile_b) -> (B, 1); drop zero-padded rows.
    return out.reshape(-1)[:B].reshape(B, OUT_DIM)


def init_params(key):
    """Deterministic init mimicking torch.nn.Linear default (uniform +- 1/sqrt(fan_in))."""
    k1, k2, k3, k4 = jax.random.split(key, 4)
    bound1 = 1.0 / jnp.sqrt(IN_DIM)
    bound2 = 1.0 / jnp.sqrt(HID_DIM)
    w1 = jax.random.uniform(k1, (IN_DIM, HID_DIM), jnp.float32, -bound1, bound1)
    b1 = jax.random.uniform(k2, (1, HID_DIM), jnp.float32, -bound1, bound1)
    w2 = jax.random.uniform(k3, (HID_DIM, OUT_DIM), jnp.float32, -bound2, bound2)
    b2 = jax.random.uniform(k4, (1, OUT_DIM), jnp.float32, -bound2, bound2)
    return w1, b1, w2, b2


def _reference(x, w1, b1, w2, b2):
    xf = x.astype(jnp.float32)
    return jax.nn.sigmoid(jnp.maximum(xf @ w1 + b1, 0.0) @ w2 + b2)


if __name__ == "__main__":
    key = jax.random.PRNGKey(0)
    kx, kp, kx2 = jax.random.split(key, 3)
    w1, b1, w2, b2 = init_params(kp)

    # Small demo batch (single grid step after adaptive tiling, ragged -> padded).
    B = 8
    x = jax.random.normal(kx, (B, IN_DIM), jnp.float32)
    out = jax.block_until_ready(identity_forward(x, w1, b1, w2, b2))
    ref = _reference(x, w1, b1, w2, b2)
    assert out.shape == (B, OUT_DIM)
    # bf16 layer-1 inputs (f32 accumulate) -> slightly relaxed tolerance.
    assert jnp.allclose(out, ref, atol=1e-2, rtol=1e-2)

    # Multi-tile + ragged-batch check (adaptive tile_b=256 -> 2 grid steps).
    B2 = 300
    x2 = jax.random.normal(kx2, (B2, IN_DIM), jnp.float32)
    out2 = jax.block_until_ready(identity_forward(x2, w1, b1, w2, b2))
    ref2 = _reference(x2, w1, b1, w2, b2)
    assert out2.shape == (B2, OUT_DIM)
    assert jnp.allclose(out2, ref2, atol=1e-2, rtol=1e-2)

    # bf16 x input path (no in-kernel cast; half the HBM traffic on the stream).
    x2_bf16 = x2.astype(jnp.bfloat16)
    out3 = jax.block_until_ready(identity_forward(x2_bf16, w1, b1, w2, b2, tile_b=128))
    ref3 = _reference(x2_bf16, w1, b1, w2, b2)
    assert out3.shape == (B2, OUT_DIM)
    assert jnp.allclose(out3, ref3, atol=2e-2, rtol=2e-2)

    print("KERNEL_OK")
</pallas_src>

<mosaic_0001>
module attributes {stable_mosaic.version = 11 : i64} {
  func.func @_identity_mlp_kernel(%arg0: i32, %arg1: memref<128x512xf32, #tpu.memory_space<vmem>>, %arg2: memref<512x256xbf16, #tpu.memory_space<vmem>>, %arg3: memref<1x256xf32, #tpu.memory_space<vmem>>, %arg4: memref<1x256xf32, #tpu.memory_space<vmem>>, %arg5: memref<1x1xf32, #tpu.memory_space<smem>>, %arg6: memref<1x1x128xf32, #tpu.memory_space<vmem>>) attributes {dimension_semantics = [#tpu.dimension_semantics<parallel>], iteration_bounds = array<i64: 1>, scalar_prefetch = 0 : i64, scratch_operands = 0 : i64, tpu.core_type = #tpu.core_type<tc>, window_params = [{transform_indices = @transform_0, window_bounds = array<i64: 128, 512>}, {pipeline_mode = #tpu.pipeline_mode<synchronous>, transform_indices = @transform_1, window_bounds = array<i64: 512, 256>}, {pipeline_mode = #tpu.pipeline_mode<synchronous>, transform_indices = @transform_2, window_bounds = array<i64: 1, 256>}, {pipeline_mode = #tpu.pipeline_mode<synchronous>, transform_indices = @transform_3, window_bounds = array<i64: 1, 256>}, {transform_indices = @transform_4, window_bounds = array<i64: 1, 1>}, {transform_indices = @transform_5, window_bounds = array<i64: 1, 1, 128>}]} {
    %c0 = arith.constant 0 : index
    %c0_0 = arith.constant 0 : index
    %0 = vector.load %arg1[%c0, %c0_0] : memref<128x512xf32, #tpu.memory_space<vmem>>, vector<128x512xf32>
    %1 = arith.truncf %0 : vector<128x512xf32> to vector<128x512xbf16>
    %c0_1 = arith.constant 0 : index
    %c0_2 = arith.constant 0 : index
    %2 = vector.load %arg2[%c0_1, %c0_2] : memref<512x256xbf16, #tpu.memory_space<vmem>>, vector<512x256xbf16>
    %cst = arith.constant dense<0.000000e+00> : vector<128x256xf32>
    %3 = tpu.matmul %1, %2, %cst {dimension_numbers = #tpu.dot_dimension_numbers<[1], [0], [0], [1], [0, 0, 1, 1], [], []>} : vector<128x512xbf16>, vector<512x256xbf16>, vector<128x256xf32> -> vector<128x256xf32>
    %c0_3 = arith.constant 0 : index
    %c0_4 = arith.constant 0 : index
    %4 = vector.load %arg3[%c0_3, %c0_4] : memref<1x256xf32, #tpu.memory_space<vmem>>, vector<1x256xf32>
    %5 = vector.broadcast %4 : vector<1x256xf32> to vector<128x256xf32>
    %6 = arith.addf %3, %5 : vector<128x256xf32>
    %cst_5 = arith.constant 0.000000e+00 : f32
    %7 = vector.broadcast %cst_5 : f32 to vector<128x256xf32>
    %8 = arith.maximumf %6, %7 : vector<128x256xf32>
    %c0_6 = arith.constant 0 : index
    %c0_7 = arith.constant 0 : index
    %9 = vector.load %arg4[%c0_6, %c0_7] : memref<1x256xf32, #tpu.memory_space<vmem>>, vector<1x256xf32>
    %cst_8 = arith.constant dense<0.000000e+00> : vector<1x128xf32>
    %10 = tpu.matmul %9, %8, %cst_8 {dimension_numbers = #tpu.dot_dimension_numbers<[1], [1], [0], [0], [0, 0, 1, 0], [], []>} : vector<1x256xf32>, vector<128x256xf32>, vector<1x128xf32> -> vector<1x128xf32>
    %c0_9 = arith.constant 0 : index
    %c0_10 = arith.constant 0 : index
    %11 = memref.load %arg5[%c0_9, %c0_10] : memref<1x1xf32, #tpu.memory_space<smem>>
    %12 = vector.broadcast %11 : f32 to vector<1x128xf32>
    %13 = arith.addf %10, %12 : vector<1x128xf32>
    %14 = arith.negf %13 : vector<1x128xf32>
    %15 = math.exp %14 : vector<1x128xf32>
    %cst_11 = arith.constant 1.000000e+00 : f32
    %16 = vector.broadcast %cst_11 : f32 to vector<1x128xf32>
    %17 = arith.addf %16, %15 : vector<1x128xf32>
    %18 = arith.divf %16, %17 : vector<1x128xf32>
    %c0_12 = arith.constant 0 : index
    %c0_13 = arith.constant 0 : index
    %c0_14 = arith.constant 0 : index
    %19 = vector.load %arg6[%c0_12, %c0_13, %c0_14] : memref<1x1x128xf32, #tpu.memory_space<vmem>>, vector<1x1x128xf32>
    %20 = vector.shape_cast %19 : vector<1x1x128xf32> to vector<1x128xf32>
    %21 = vector.shape_cast %18 : vector<1x128xf32> to vector<1x1x128xf32>
    tpu.vector_store %arg6[%c0_12, %c0_13, %c0_14], %21 {strides = array<i32>} : memref<1x1x128xf32, #tpu.memory_space<vmem>>, vector<1x1x128xf32>,
    return
  }
  func.func @transform_0(%arg0: i32) -> (i32, i32) {
    %c0_i32 = arith.constant 0 : i32
    %c0_i32_0 = arith.constant 0 : i32
    return %arg0, %c0_i32 : i32, i32
  }
  func.func @transform_1(%arg0: i32) -> (i32, i32) {
    %c0_i32 = arith.constant 0 : i32
    %c0_i32_0 = arith.constant 0 : i32
    %c0_i32_1 = arith.constant 0 : i32
    return %c0_i32, %c0_i32_0 : i32, i32
  }
  func.func @transform_2(%arg0: i32) -> (i32, i32) {
    %c0_i32 = arith.constant 0 : i32
    %c0_i32_0 = arith.constant 0 : i32
    %c0_i32_1 = arith.constant 0 : i32
    return %c0_i32, %c0_i32_0 : i32, i32
  }
  func.func @transform_3(%arg0: i32) -> (i32, i32) {
    %c0_i32 = arith.constant 0 : i32
    %c0_i32_0 = arith.constant 0 : i32
    %c0_i32_1 = arith.constant 0 : i32
    return %c0_i32, %c0_i32_0 : i32, i32
  }
  func.func @transform_4(%arg0: i32) -> (i32, i32) {
    %c0_i32 = arith.constant 0 : i32
    %c0_i32_0 = arith.constant 0 : i32
    %c0_i32_1 = arith.constant 0 : i32
    return %c0_i32, %c0_i32_0 : i32, i32
  }
  func.func @transform_5(%arg0: i32) -> (i32, i32, i32) {
    %c0_i32 = arith.constant 0 : i32
    %c0_i32_0 = arith.constant 0 : i32
    %c0_i32_1 = arith.constant 0 : i32
    return %arg0, %c0_i32, %c0_i32_0 : i32, i32, i32
  }
}

</mosaic_0001>

<bundles_post_ra>
// kernel: tpu_custom_call.1
= control target key start
LH: loop header
LB: loop body
LE: loop exit
PB: predicated region body
PF: predicated region fallthrough
CT: control target
= control target key end

     0   :  { %11 = vsyncpa [#allocation4], 0  ;;  %s1377_s0 = inlined_call_operand.hbm [shape: f32[128,512], index: 0, kind: input, shape index: {}]   ;;  %s1378_s1 = inlined_call_operand.hbm [shape: bf16[512,256], index: 1, kind: input, shape index: {}]   ;;  %s1379_s2 = inlined_call_operand.vmem [shape: f32[1,256], index: 2, kind: input, shape index: {}]   ;;  %s1380_s3 = inlined_call_operand.vmem [shape: f32[1,256], index: 3, kind: input, shape index: {}]   ;;  %s1381_s4 = inlined_call_operand.<no memory space> [shape: f32[1,1], index: 4, kind: input, shape index: {}]   ;;  %s1382_s5 = inlined_call_operand.hbm [shape: f32[1,1,128], index: 5, kind: output, shape index: {}]  }
   0x1   :  { %12 = vsyncpa [#allocation7], 0 }
   0x2   :  { %13 = vsyncpa [#allocation5], 0  ;;  %s1247_s18 = smov [#allocation3]   ;;  %s1175_s22 = scalar_lea.hbm %s1377_s0, 8192 }
   0x3   :  { %s19_s19 = sshll.u32 %s1247_s18, 4  ;;  %p1176_p0 = scmp.ne.s32.totalorder %s1377_s0, %s1175_s22  ;;  %s20_s19 = int_to_ptr.vmem [resolvable:$true] %s19_s19 }
   0x4   :  { %p1179_p1 = scmp.lt.u32.totalorder %s1175_s22, %s1377_s0 }
   0x6   :  { %p1181_p2 = pnand %p1179_p1, %p1176_p0 }
   0x8   :  { %1184 = shalt.err (!%p1181_p2)
}
   0x9   :  { %s1185_s27 = scalar_lea.vmem %s20_s19, 8192  ;;  %p1190_p4 = scmp.lt.s32.totalorder %s20_s19, %s20_s19 }
   0xa   :  { %p1186_p3 = scmp.ne.s32.totalorder %s20_s19, %s1185_s27  ;;  %p1191_p5 = scmp.lt.s32.totalorder %s1185_s27, %s1185_s27 }
   0xc   :  { %p1192_p6 = por %p1191_p5, %p1190_p4 }
   0xe   :  { %p1193_p7 = pnand %p1192_p6, %p1186_p3 }
  0x10   :  { %1196 = shalt.err (!%p1193_p7)
}
  0x11   :  { %s1248_s28 = smov 512   ;;  %s1249_s29 = smov 32  }
  0x12   :  { %25 = dma.hbm_to_vmem [thread:$0]  %s1377_s0, 8192, %s20_s19, [#allocation4], %s1248_s28, %s1248_s28, %s1249_s29  }
  0x13   :  { %s1250_s7 = smov [#allocation6]   ;;  %s1197_s11 = scalar_lea.hbm %s1378_s1, 8192 }
  0x14   :  { %s31_s8 = sshll.u32 %s1250_s7, 4  ;;  %p1198_p8 = scmp.ne.s32.totalorder %s1378_s1, %s1197_s11  ;;  %s32_s8 = int_to_ptr.vmem [resolvable:$true] %s31_s8 }
  0x15   :  { %p1201_p9 = scmp.lt.u32.totalorder %s1197_s11, %s1378_s1 }
  0x17   :  { %p1203_p10 = pnand %p1201_p9, %p1198_p8 }
  0x19   :  { %1206 = shalt.err (!%p1203_p10)
}
  0x1a   :  { %s1207_s16 = scalar_lea.vmem %s32_s8, 8192  ;;  %p1212_p12 = scmp.lt.s32.totalorder %s32_s8, %s32_s8 }
  0x1b   :  { %p1208_p11 = scmp.ne.s32.totalorder %s32_s8, %s1207_s16  ;;  %p1213_p13 = scmp.lt.s32.totalorder %s1207_s16, %s1207_s16 }
  0x1d   :  { %p1214_p0 = por %p1213_p13, %p1212_p12 }
  0x1f   :  { %p1215_p1 = pnand %p1214_p0, %p1208_p11 }
  0x21   :  { %1218 = shalt.err (!%p1215_p1)
}
  0x22   :  { %s1251_s0 = smov 128   ;;  %s1252_s17 = smov 8  }
  0x23   :  { %37 = dma.hbm_to_vmem [thread:$0]  %s1378_s1, 8192, %s32_s8, [#allocation7], %s1251_s0, %s1251_s0, %s1252_s17  }
  0x24   :  { %1241 = dma.done.wait [#allocation4], 8192  }
  0x25   :  { %1242 = vsyncadd [#allocation4], 4294959104 }
  0x26   :  { %1243 = dma.done.wait [#allocation7], 8192  }
  0x27   :  { %1244 = vsyncadd [#allocation7], 4294959104  ;;  %v1075_v0 = vld [vmem:[#allocation6 + $0x4] ss:$8 sps:$4 sm:$0xff]   ;;  %v1079_v2 = vld [vmem:[#allocation6] ss:$8 sps:$4 sm:$0xff]  }
  0x28   :  { %v1077_v1 = vld [vmem:[#allocation6 + $0x104] ss:$8 sps:$4 sm:$0xff]   ;;  %542 = vmatprep.subr.bf16.mxu1 %v1075_v0  ;;  %v1080_v3 = vld [vmem:[#allocation6 + $0x100] ss:$8 sps:$4 sm:$0xff]   ;;  %v1081_v4 = vld [vmem:[#allocation6 + $0x14] ss:$8 sps:$4 sm:$0xff]  }
  0x29   :  { %655 = vmatprep.subr.bf16.mxu0 %v1077_v1  ;;  %543 = vmatpush1.bf16.msra.mxu1 %v1079_v2  ;;  %v1083_v5 = vld [vmem:[#allocation6 + $0x114] ss:$8 sps:$4 sm:$0xff]   ;;  %v1085_v6 = vld [vmem:[#allocation6 + $0x10] ss:$8 sps:$4 sm:$0xff]   ;;  %v1087_v8 = vld [vmem:[#allocation6 + $0x24] ss:$8 sps:$4 sm:$0xff]  }
  0x2a   :  { %656 = vmatpush1.bf16.msra.mxu0 %v1080_v3  ;;  %544 = vmatprep.subr.bf16.mxu1 %v1081_v4  ;;  %v1086_v7 = vld [vmem:[#allocation6 + $0x110] ss:$8 sps:$4 sm:$0xff]   ;;  %v1089_v9 = vld [vmem:[#allocation6 + $0x124] ss:$8 sps:$4 sm:$0xff]   ;;  %v1091_v10 = vld [vmem:[#allocation6 + $0x20] ss:$8 sps:$4 sm:$0xff]  }
  0x2b   :  { %657 = vmatprep.subr.bf16.mxu0 %v1083_v5  ;;  %v1092_v11 = vld [vmem:[#allocation6 + $0x120] ss:$8 sps:$4 sm:$0xff]   ;;  %v1093_v12 = vld [vmem:[#allocation6 + $0x34] ss:$8 sps:$4 sm:$0xff]   ;;  %v1097_v14 = vld [vmem:[#allocation6 + $0x30] ss:$8 sps:$4 sm:$0xff]  }
  0x2c   :  { %v1095_v13 = vld [vmem:[#allocation6 + $0x134] ss:$8 sps:$4 sm:$0xff]   ;;  %v1098_v15 = vld [vmem:[#allocation6 + $0x130] ss:$8 sps:$4 sm:$0xff]   ;;  %v1099_v16 = vld [vmem:[#allocation6 + $0x44] ss:$8 sps:$4 sm:$0xff]  }
  0x2d   :  { %545 = vmatpush1.bf16.msra.mxu1 %v1085_v6  ;;  %v1101_v17 = vld [vmem:[#allocation6 + $0x144] ss:$8 sps:$4 sm:$0xff]   ;;  %v1103_v18 = vld [vmem:[#allocation6 + $0x40] ss:$8 sps:$4 sm:$0xff]   ;;  %v1105_v20 = vld [vmem:[#allocation6 + $0x54] ss:$8 sps:$4 sm:$0xff]  }
  0x2e   :  { %658 = vmatpush1.bf16.msra.mxu0 %v1086_v7  ;;  %546 = vmatprep.subr.bf16.mxu1 %v1087_v8  ;;  %v1104_v19 = vld [vmem:[#allocation6 + $0x140] ss:$8 sps:$4 sm:$0xff]   ;;  %v1107_v21 = vld [vmem:[#allocation6 + $0x154] ss:$8 sps:$4 sm:$0xff]   ;;  %v1109_v22 = vld [vmem:[#allocation6 + $0x50] ss:$8 sps:$4 sm:$0xff]  }
  0x2f   :  { %659 = vmatprep.subr.bf16.mxu0 %v1089_v9  ;;  %v1110_v23 = vld [vmem:[#allocation6 + $0x150] ss:$8 sps:$4 sm:$0xff]   ;;  %v1111_v24 = vld [vmem:[#allocation6 + $0x64] ss:$8 sps:$4 sm:$0xff]   ;;  %v1115_v26 = vld [vmem:[#allocation6 + $0x60] ss:$8 sps:$4 sm:$0xff]  }
  0x30   :  { %v1113_v25 = vld [vmem:[#allocation6 + $0x164] ss:$8 sps:$4 sm:$0xff]   ;;  %v1116_v27 = vld [vmem:[#allocation6 + $0x160] ss:$8 sps:$4 sm:$0xff]   ;;  %v1117_v28 = vld [vmem:[#allocation6 + $0x74] ss:$8 sps:$4 sm:$0xff]  }
  0x31   :  { %547 = vmatpush1.bf16.msra.mxu1 %v1091_v10  ;;  %v1119_v29 = vld [vmem:[#allocation6 + $0x174] ss:$8 sps:$4 sm:$0xff]   ;;  %v1121_v30 = vld [vmem:[#allocation6 + $0x70] ss:$8 sps:$4 sm:$0xff]   ;;  %v1123_v32 = vld [vmem:[#allocation6 + $0x84] ss:$8 sps:$4 sm:$0xff]  }
  0x32   :  { %660 = vmatpush1.bf16.msra.mxu0 %v1092_v11  ;;  %548 = vmatprep.subr.bf16.mxu1 %v1093_v12  ;;  %v1122_v31 = vld [vmem:[#allocation6 + $0x170] ss:$8 sps:$4 sm:$0xff]   ;;  %v1125_v33 = vld [vmem:[#allocation6 + $0x184] ss:$8 sps:$4 sm:$0xff]   ;;  %v1127_v34 = vld [vmem:[#allocation6 + $0x80] ss:$8 sps:$4 sm:$0xff]  }
  0x33   :  { %661 = vmatprep.subr.bf16.mxu0 %v1095_v13  ;;  %v1128_v35 = vld [vmem:[#allocation6 + $0x180] ss:$8 sps:$4 sm:$0xff]   ;;  %v1129_v36 = vld [vmem:[#allocation6 + $0x94] ss:$8 sps:$4 sm:$0xff]   ;;  %v1133_v38 = vld [vmem:[#allocation6 + $0x90] ss:$8 sps:$4 sm:$0xff]  }
  0x34   :  { %v1131_v37 = vld [vmem:[#allocation6 + $0x194] ss:$8 sps:$4 sm:$0xff]   ;;  %v1134_v39 = vld [vmem:[#allocation6 + $0x190] ss:$8 sps:$4 sm:$0xff]   ;;  %v1135_v40 = vld [vmem:[#allocation6 + $0xa4] ss:$8 sps:$4 sm:$0xff]  }
  0x35   :  { %549 = vmatpush1.bf16.msra.mxu1 %v1097_v14  ;;  %v1137_v41 = vld [vmem:[#allocation6 + $0x1a4] ss:$8 sps:$4 sm:$0xff]   ;;  %v1139_v42 = vld [vmem:[#allocation6 + $0xa0] ss:$8 sps:$4 sm:$0xff]   ;;  %v1141_v44 = vld [vmem:[#allocation6 + $0xb4] ss:$8 sps:$4 sm:$0xff]  }
  0x36   :  { %662 = vmatpush1.bf16.msra.mxu0 %v1098_v15  ;;  %550 = vmatprep.subr.bf16.mxu1 %v1099_v16  ;;  %v1140_v43 = vld [vmem:[#allocation6 + $0x1a0] ss:$8 sps:$4 sm:$0xff]   ;;  %v1143_v45 = vld [vmem:[#allocation6 + $0x1b4] ss:$8 sps:$4 sm:$0xff]   ;;  %v1145_v50 = vld [vmem:[#allocation6 + $0xb0] ss:$8 sps:$4 sm:$0xff]  }
  0x37   :  { %663 = vmatprep.subr.bf16.mxu0 %v1101_v17  ;;  %v51_v46 = vld [vmem:[#allocation3 + $0x8] sm:$0xff]  ;;  %v53_v48 = vld [vmem:[#allocation3 + $0x18] sm:$0xff]  ;;  %v50_v6 = vld [vmem:[#allocation3] sm:$0xff]  ;;  %s1253_s23 = smov [#allocation8]  }
  0x38   :  { %v55_v47 = vld [vmem:[#allocation3 + $0x28] sm:$0xff]  ;;  %v57_v49 = vld [vmem:[#allocation3 + $0x38] sm:$0xff]  ;;  %v54_v7 = vld [vmem:[#allocation3 + $0x20] sm:$0xff]  ;;  %s897_s24 = sshll.u32 %s1253_s23, 4  ;;  %s898_s24 = int_to_ptr.vmem [resolvable:$true] %s897_s24 }
  0x39   :  { %551 = vmatpush1.bf16.msra.mxu1 %v1103_v18  ;;  %v1146_v51 = vld [vmem:[#allocation6 + $0x1b0] ss:$8 sps:$4 sm:$0xff]   ;;  %v115_v52 = vpack.c.bf16 %v55_v47, %v51_v46  ;;  %v117_v53 = vpack.c.bf16 %v57_v49, %v53_v48  ;;  %v1147_v54 = vld [vmem:[#allocation6 + $0xc4] ss:$8 sps:$4 sm:$0xff]   ;;  %v1151_v56 = vld [vmem:[#allocation6 + $0xc0] ss:$8 sps:$4 sm:$0xff]   ;;  %v114_v14 = vpack.c.bf16 %v54_v7, %v50_v6  ;;  %p1224_p3 = scmp.lt.s32.totalorder %s898_s24, %s898_s24 }
  0x3a   :  { %664 = vmatpush1.bf16.msra.mxu0 %v1104_v19  ;;  %552 = vmatprep.subr.bf16.mxu1 %v1105_v20  ;;  %v1149_v55 = vld [vmem:[#allocation6 + $0x1c4] ss:$8 sps:$4 sm:$0xff]   ;;  %v1152_v57 = vld [vmem:[#allocation6 + $0x1c0] ss:$8 sps:$4 sm:$0xff]   ;;  %v1153_v58 = vld [vmem:[#allocation6 + $0xd4] ss:$8 sps:$4 sm:$0xff]  }
  0x3b   :  { %665 = vmatprep.subr.bf16.mxu0 %v1107_v21  ;;  %574 = vmatprep.mubr.bf16.mxu1 %v115_v52  ;;  %v1155_v59 = vld [vmem:[#allocation6 + $0x1d4] ss:$8 sps:$4 sm:$0xff]   ;;  %v1157_v60 = vld [vmem:[#allocation6 + $0xd0] ss:$8 sps:$4 sm:$0xff]   ;;  %v1159_v62 = vld [vmem:[#allocation6 + $0xe4] ss:$8 sps:$4 sm:$0xff]  }
  0x3c   :  { %687 = vmatprep.mubr.bf16.mxu0 %v117_v53  ;;  %v1158_v61 = vld [vmem:[#allocation6 + $0x1d0] ss:$8 sps:$4 sm:$0xff]   ;;  %v1161_v63 = vld [vmem:[#allocation6 + $0x1e4] ss:$8 sps:$4 sm:$0xff]   ;;  %v1163_v0 = vld [vmem:[#allocation6 + $0xe0] ss:$8 sps:$4 sm:$0xff]  }
  0x3d   :  { %553 = vmatpush1.bf16.msra.mxu1 %v1109_v22  ;;  %v1164_v1 = vld [vmem:[#allocation6 + $0x1e0] ss:$8 sps:$4 sm:$0xff]   ;;  %v1165_v2 = vld [vmem:[#allocation6 + $0xf4] ss:$8 sps:$4 sm:$0xff]   ;;  %v1169_v4 = vld [vmem:[#allocation6 + $0xf0] ss:$8 sps:$4 sm:$0xff]  }
  0x3e   :  { %666 = vmatpush1.bf16.msra.mxu0 %v1110_v23  ;;  %554 = vmatprep.subr.bf16.mxu1 %v1111_v24  ;;  %v1167_v3 = vld [vmem:[#allocation6 + $0x1f4] ss:$8 sps:$4 sm:$0xff]   ;;  %v1170_v5 = vld [vmem:[#allocation6 + $0x1f0] ss:$8 sps:$4 sm:$0xff]   ;;  %v59_v10 = vld [vmem:[#allocation3 + $0x48] sm:$0xff]  ;;  %s1219_s25 = scalar_lea.vmem %s898_s24, 16 }
  0x3f   :  { %667 = vmatprep.subr.bf16.mxu0 %v1113_v25  ;;  %v52_v8 = vld [vmem:[#allocation3 + $0x10] sm:$0xff]  ;;  %v63_v11 = vld [vmem:[#allocation3 + $0x68] sm:$0xff]  ;;  %v61_v12 = vld [vmem:[#allocation3 + $0x58] sm:$0xff]  ;;  %p1220_p2 = scmp.ne.s32.totalorder %s898_s24, %s1219_s25  ;;  %s1223_s26 = scalar_lea.vmem %s898_s24, 32 }
  0x40   :  { %v56_v9 = vld [vmem:[#allocation3 + $0x30] sm:$0xff]  ;;  %v65_v13 = vld [vmem:[#allocation3 + $0x78] sm:$0xff]  ;;  %v119_v16 = vpack.c.bf16 %v63_v11, %v59_v10  ;;  %v58_v18 = vld [vmem:[#allocation3 + $0x40] sm:$0xff]  ;;  %p1225_p4 = scmp.lt.s32.totalorder %s1223_s26, %s1219_s25 }
  0x41   :  { %555 = vmatpush1.bf16.msra.mxu1 %v1115_v26  ;;  %v116_v15 = vpack.c.bf16 %v56_v9, %v52_v8  ;;  %v121_v17 = vpack.c.bf16 %v65_v13, %v61_v12  ;;  %v62_v19 = vld [vmem:[#allocation3 + $0x60] sm:$0xff]  ;;  %v60_v20 = vld [vmem:[#allocation3 + $0x50] sm:$0xff]  ;;  %v67_v22 = vld [vmem:[#allocation3 + $0x88] sm:$0xff] }
  0x42   :  { %668 = vmatpush1.bf16.msra.mxu0 %v1116_v27  ;;  %556 = vmatprep.subr.bf16.mxu1 %v1117_v28  ;;  %v64_v21 = vld [vmem:[#allocation3 + $0x70] sm:$0xff]  ;;  %v71_v23 = vld [vmem:[#allocation3 + $0xa8] sm:$0xff]  ;;  %v69_v24 = vld [vmem:[#allocation3 + $0x98] sm:$0xff]  ;;  %v118_v26 = vpack.c.bf16 %v62_v19, %v58_v18  ;;  %p1226_p5 = por %p1225_p4, %p1224_p3 }
  0x43   :  { %669 = vmatprep.subr.bf16.mxu0 %v1119_v29  ;;  %v73_v25 = vld [vmem:[#allocation3 + $0xb8] sm:$0xff]  ;;  %v120_v27 = vpack.c.bf16 %v64_v21, %v60_v20  ;;  %v123_v28 = vpack.c.bf16 %v71_v23, %v67_v22  ;;  %v83_v46 = vld [vmem:[#allocation3 + $0x108] sm:$0xff] }
  0x44   :  { %v125_v29 = vpack.c.bf16 %v73_v25, %v69_v24  ;;  %v87_v47 = vld [vmem:[#allocation3 + $0x128] sm:$0xff]  ;;  %v85_v48 = vld [vmem:[#allocation3 + $0x118] sm:$0xff]  ;;  %p1227_p6 = pnand %p1226_p5, %p1220_p2 }
  0x45   :  { %557 = vmatpush1.bf16.msra.mxu1 %v1121_v30  ;;  %v66_v30 = vld [vmem:[#allocation3 + $0x80] sm:$0xff]  ;;  %v89_v49 = vld [vmem:[#allocation3 + $0x138] sm:$0xff]  ;;  %v131_v52 = vpack.c.bf16 %v87_v47, %v83_v46  ;;  %v99_v6 = vld [vmem:[#allocation3 + $0x188] sm:$0xff] }
  0x46   :  { %670 = vmatpush1.bf16.msra.mxu0 %v1122_v31  ;;  %558 = vmatprep.subr.bf16.mxu1 %v1123_v32  ;;  %v70_v31 = vld [vmem:[#allocation3 + $0xa0] sm:$0xff]  ;;  %v68_v32 = vld [vmem:[#allocation3 + $0x90] sm:$0xff]  ;;  %v133_v53 = vpack.c.bf16 %v89_v49, %v85_v48  ;;  %v103_v7 = vld [vmem:[#allocation3 + $0x1a8] sm:$0xff] }
  0x47   :  { %671 = vmatprep.subr.bf16.mxu0 %v1125_v33  ;;  %v72_v33 = vld [vmem:[#allocation3 + $0xb0] sm:$0xff]  ;;  %v101_v8 = vld [vmem:[#allocation3 + $0x198] sm:$0xff]  ;;  %v139_v12 = vpack.c.bf16 %v103_v7, %v99_v6  ;;  %v107_v18 = vld [vmem:[#allocation3 + $0x1c8] sm:$0xff] }
  0x48   :  { %v105_v9 = vld [vmem:[#allocation3 + $0x1b8] sm:$0xff]  ;;  %v111_v19 = vld [vmem:[#allocation3 + $0x1e8] sm:$0xff] }
  0x49   :  { %559 = vmatpush1.bf16.msra.mxu1 %v1127_v34  ;;  %v75_v34 = vld [vmem:[#allocation3 + $0xc8] sm:$0xff]  ;;  %v141_v13 = vpack.c.bf16 %v105_v9, %v101_v8  ;;  %v109_v20 = vld [vmem:[#allocation3 + $0x1d8] sm:$0xff]  ;;  %v143_v24 = vpack.c.bf16 %v111_v19, %v107_v18 }
  0x4a   :  { %672 = vmatpush1.bf16.msra.mxu0 %v1128_v35  ;;  %560 = vmatprep.subr.bf16.mxu1 %v1129_v36  ;;  %v79_v35 = vld [vmem:[#allocation3 + $0xe8] sm:$0xff]  ;;  %v77_v36 = vld [vmem:[#allocation3 + $0xd8] sm:$0xff] }
  0x4b   :  { %673 = vmatprep.subr.bf16.mxu0 %v1131_v37  ;;  %v81_v37 = vld [vmem:[#allocation3 + $0xf8] sm:$0xff] }
  0x4c   :  { %v113_v21 = vld [vmem:[#allocation3 + $0x1f8] sm:$0xff] }
  0x4d   :  { %561 = vmatpush1.bf16.msra.mxu1 %v1133_v38  ;;  %v122_v38 = vpack.c.bf16 %v70_v31, %v66_v30  ;;  %v145_v25 = vpack.c.bf16 %v113_v21, %v109_v20 }
  0x4e   :  { %674 = vmatpush1.bf16.msra.mxu0 %v1134_v39  ;;  %562 = vmatprep.subr.bf16.mxu1 %v1135_v40  ;;  %v124_v39 = vpack.c.bf16 %v72_v33, %v68_v32  ;;  %v127_v40 = vpack.c.bf16 %v79_v35, %v75_v34  ;;  %v212_v32 = vlaneseq  ;;  %v1314_v35 = vld [vmem:[%s1380_s3] sm:$0x3] }
  0x4f   :  { %675 = vmatprep.subr.bf16.mxu0 %v1137_v41  ;;  %v129_v41 = vpack.c.bf16 %v81_v37, %v77_v36 }
  0x50   :  { %v1308_v33 = vshrl.u32 %v212_v32, 7 }
  0x51   :  { %563 = vmatpush1.bf16.msra.mxu1 %v1139_v42  ;;  %v74_v42 = vld [vmem:[#allocation3 + $0xc0] sm:$0xff] }
  0x52   :  { %676 = vmatpush1.bf16.msra.mxu0 %v1140_v43  ;;  %564 = vmatprep.subr.bf16.mxu1 %v1141_v44  ;;  %v78_v43 = vld [vmem:[#allocation3 + $0xe0] sm:$0xff]  ;;  %v76_v44 = vld [vmem:[#allocation3 + $0xd0] sm:$0xff]  ;;  %v218_v34 = vsub.s32 1, %v1308_v33  ;;  %v214_v37 = vsub.s32 0, %v1308_v33 }
  0x53   :  { %677 = vmatprep.subr.bf16.mxu0 %v1143_v45  ;;  %v80_v45 = vld [vmem:[#allocation3 + $0xf0] sm:$0xff] }
  0x54   :  { %v811_v36 = vrot.slane %v1314_v35, %v218_v34 }
  0x55   :  { %565 = vmatpush1.bf16.msra.mxu1 %v1145_v50  ;;  %v126_v50 = vpack.c.bf16 %v78_v43, %v74_v42 }
  0x56   :  { %678 = vmatpush1.bf16.msra.mxu0 %v1146_v51  ;;  %566 = vmatprep.subr.bf16.mxu1 %v1147_v54  ;;  %v128_v51 = vpack.c.bf16 %v80_v45, %v76_v44  ;;  %v82_v54 = vld [vmem:[#allocation3 + $0x100] sm:$0xff] }
  0x57   :  { %679 = vmatprep.subr.bf16.mxu0 %v1149_v55  ;;  %v86_v55 = vld [vmem:[#allocation3 + $0x120] sm:$0xff] }
  0x59   :  { %567 = vmatpush1.bf16.msra.mxu1 %v1151_v56  ;;  %v84_v56 = vld [vmem:[#allocation3 + $0x110] sm:$0xff] }
  0x5a   :  { %680 = vmatpush1.bf16.msra.mxu0 %v1152_v57  ;;  %568 = vmatprep.subr.bf16.mxu1 %v1153_v58  ;;  %v88_v57 = vld [vmem:[#allocation3 + $0x130] sm:$0xff]  ;;  %v91_v58 = vld [vmem:[#allocation3 + $0x148] sm:$0xff] }
  0x5b   :  { %681 = vmatprep.subr.bf16.mxu0 %v1155_v59  ;;  %v95_v59 = vld [vmem:[#allocation3 + $0x168] sm:$0xff] }
  0x5d   :  { %569 = vmatpush1.bf16.msra.mxu1 %v1157_v60  ;;  %v93_v60 = vld [vmem:[#allocation3 + $0x158] sm:$0xff] }
  0x5e   :  { %682 = vmatpush1.bf16.msra.mxu0 %v1158_v61  ;;  %570 = vmatprep.subr.bf16.mxu1 %v1159_v62  ;;  %v97_v61 = vld [vmem:[#allocation3 + $0x178] sm:$0xff]  ;;  %v130_v62 = vpack.c.bf16 %v86_v55, %v82_v54 }
  0x5f   :  { %683 = vmatprep.subr.bf16.mxu0 %v1161_v63  ;;  %v132_v63 = vpack.c.bf16 %v88_v57, %v84_v56 }
  0x61   :  { %571 = vmatpush1.bf16.msra.mxu1 %v1163_v0  ;;  %v135_v0 = vpack.c.bf16 %v95_v59, %v91_v58 }
  0x62   :  { %684 = vmatpush1.bf16.msra.mxu0 %v1164_v1  ;;  %572 = vmatprep.subr.bf16.mxu1 %v1165_v2  ;;  %v137_v1 = vpack.c.bf16 %v97_v61, %v93_v60  ;;  %v90_v2 = vld [vmem:[#allocation3 + $0x140] sm:$0xff] }
  0x63   :  { %685 = vmatprep.subr.bf16.mxu0 %v1167_v3  ;;  %v94_v3 = vld [vmem:[#allocation3 + $0x160] sm:$0xff] }
  0x64   :  { %v134_v10 = vpack.c.bf16 %v94_v3, %v90_v2 }
  0x65   :  { %573 = vmatpush1.bf16.msra.mxu1 %v1169_v4  ;;  %v92_v4 = vld [vmem:[#allocation3 + $0x150] sm:$0xff] }
  0x66   :  { %686 = vmatpush1.bf16.msra.mxu0 %v1170_v5  ;;  %v96_v5 = vld [vmem:[#allocation3 + $0x170] sm:$0xff] }
  0x67   :  { %v136_v11 = vpack.c.bf16 %v96_v5, %v92_v4 }
  0x68   :  { %575 = vmatmul.mubr.bf16.vlgmr.msra.gmra.mrb[0].mxu1 %v114_v14  ;;  %v98_v14 = vld [vmem:[#allocation3 + $0x180] sm:$0xff] }
  0x69   :  { %688 = vmatmul.mubr.bf16.vlgmr.msra.gmra.mrb[0].mxu0 %v116_v15  ;;  %584 = vmatprep.mubr.bf16.mxu1 %v119_v16  ;;  %v102_v15 = vld [vmem:[#allocation3 + $0x1a0] sm:$0xff]  ;;  %v100_v16 = vld [vmem:[#allocation3 + $0x190] sm:$0xff] }
  0x6a   :  { %697 = vmatprep.mubr.bf16.mxu0 %v121_v17  ;;  %v104_v17 = vld [vmem:[#allocation3 + $0x1b0] sm:$0xff]  ;;  %v138_v22 = vpack.c.bf16 %v102_v15, %v98_v14 }
  0x6b   :  { %v140_v23 = vpack.c.bf16 %v104_v17, %v100_v16 }
  0x70   :  { %585 = vmatmul.mubr.bf16.gmra.mrb[4].mxu1 %v118_v26  ;;  %v106_v26 = vld [vmem:[#allocation3 + $0x1c0] sm:$0xff] }
  0x71   :  { %698 = vmatmul.mubr.bf16.gmra.mrb[4].mxu0 %v120_v27  ;;  %594 = vmatprep.mubr.bf16.mxu1 %v123_v28  ;;  %v110_v27 = vld [vmem:[#allocation3 + $0x1e0] sm:$0xff]  ;;  %v108_v28 = vld [vmem:[#allocation3 + $0x1d0] sm:$0xff] }
  0x72   :  { %707 = vmatprep.mubr.bf16.mxu0 %v125_v29  ;;  %v112_v29 = vld [vmem:[#allocation3 + $0x1f0] sm:$0xff]  ;;  %v142_v30 = vpack.c.bf16 %v110_v27, %v106_v26 }
  0x73   :  { %v144_v31 = vpack.c.bf16 %v112_v29, %v108_v28 }
  0x78   :  { %595 = vmatmul.mubr.bf16.gmra.mrb[8].mxu1 %v122_v38  ;;  %v210_v38 = vld [vmem:[%s1379_s2] sm:$0x3] }
  0x79   :  { %708 = vmatmul.mubr.bf16.gmra.mrb[8].mxu0 %v124_v39  ;;  %604 = vmatprep.mubr.bf16.mxu1 %v127_v40  ;;  %v1323_v39 = vrot.slane %v210_v38, %v214_v37  ;;  %v1325_v40 = vrot.slane %v210_v38, %v218_v34 }
  0x7a   :  { %717 = vmatprep.mubr.bf16.mxu0 %v129_v41 }
  0x80   :  { %605 = vmatmul.mubr.bf16.gmra.mrb[12].mxu1 %v126_v50 }
  0x81   :  { %718 = vmatmul.mubr.bf16.gmra.mrb[12].mxu0 %v128_v51  ;;  %614 = vmatprep.mubr.bf16.mxu1 %v131_v52 }
  0x82   :  { %727 = vmatprep.mubr.bf16.mxu0 %v133_v53 }
  0x88   :  { %615 = vmatmul.mubr.bf16.gmra.mrb[16].mxu1 %v130_v62 }
  0x89   :  { %728 = vmatmul.mubr.bf16.gmra.mrb[16].mxu0 %v132_v63  ;;  %624 = vmatprep.mubr.bf16.mxu1 %v135_v0 }
  0x8a   :  { %737 = vmatprep.mubr.bf16.mxu0 %v137_v1 }
  0x90   :  { %625 = vmatmul.mubr.bf16.gmra.mrb[20].mxu1 %v134_v10 }
  0x91   :  { %738 = vmatmul.mubr.bf16.gmra.mrb[20].mxu0 %v136_v11  ;;  %634 = vmatprep.mubr.bf16.mxu1 %v139_v12 }
  0x92   :  { %747 = vmatprep.mubr.bf16.mxu0 %v141_v13 }
  0x98   :  { %635 = vmatmul.mubr.bf16.gmra.mrb[24].mxu1 %v138_v22 }
  0x99   :  { %748 = vmatmul.mubr.bf16.gmra.mrb[24].mxu0 %v140_v23  ;;  %644 = vmatprep.mubr.bf16.mxu1 %v143_v24 }
  0x9a   :  { %757 = vmatprep.mubr.bf16.mxu0 %v145_v25 }
  0xa0   :  { %645 = vmatmul.mubr.bf16.gmra.mrb[28].mxu1 %v142_v30 }
  0xa1   :  { %758 = vmatmul.mubr.bf16.gmra.mrb[28].mxu0 %v144_v31  ;;  %878 = vmatprep.mubr.f32.mxu1 %v811_v36 }
 0x13b   :  { %v576_v41 = vpop.f32.mrb[0].mxu1 }
 0x13c   :  { %v689_v42 = vpop.f32.mrb[0].mxu0  ;;  %v577_v43 = vadd.f32 %v576_v41, %v1323_v39  ;;  %v578_v44 = vpop.f32.mrb[1].mxu1 }
 0x13d   :  { %v691_v45 = vpop.f32.mrb[1].mxu0  ;;  %v579_v46 = vadd.f32 %v578_v44, %v1325_v40  ;;  %v580_v47 = vpop.f32.mrb[2].mxu1 }
 0x13e   :  { %v693_v48 = vpop.f32.mrb[2].mxu0  ;;  %v690_v49 = vadd.f32 %v689_v42, %v577_v43  ;;  %v581_v50 = vadd.f32 %v580_v47, %v1323_v39  ;;  %v582_v51 = vpop.f32.mrb[3].mxu1 }
 0x13f   :  { %v695_v52 = vpop.f32.mrb[3].mxu0  ;;  %v692_v53 = vadd.f32 %v691_v45, %v579_v46  ;;  %v583_v54 = vadd.f32 %v582_v51, %v1325_v40 }
 0x140   :  { %v694_v55 = vadd.f32 %v693_v48, %v581_v50  ;;  %v768_v57 = vmax.f32 %v690_v49, 0.0 }
 0x141   :  { %v696_v56 = vadd.f32 %v695_v52, %v583_v54  ;;  %v769_v59 = vmax.f32 %v692_v53, 0.0 }
 0x142   :  { %v770_v58 = vmax.f32 %v694_v55, 0.0 }
 0x143   :  { %v771_v60 = vmax.f32 %v696_v56, 0.0  ;;  %v586_v61 = vpop.f32.mrb[4].mxu1 }
 0x144   :  { %v699_v62 = vpop.f32.mrb[4].mxu0  ;;  %v974_v63 = vpack.c.bf16 %v770_v58, %v768_v57  ;;  %v587_v0 = vadd.f32 %v586_v61, %v1323_v39  ;;  %v588_v1 = vpop.f32.mrb[5].mxu1 }
 0x145   :  { %v701_v2 = vpop.f32.mrb[5].mxu0  ;;  %v972_v3 = vpack.c.bf16 %v771_v60, %v769_v59  ;;  %v589_v4 = vadd.f32 %v588_v1, %v1325_v40  ;;  %v590_v5 = vpop.f32.mrb[6].mxu1 }
 0x146   :  { %v703_v6 = vpop.f32.mrb[6].mxu0  ;;  %v700_v7 = vadd.f32 %v699_v62, %v587_v0  ;;  %v591_v8 = vadd.f32 %v590_v5, %v1323_v39  ;;  %v592_v9 = vpop.f32.mrb[7].mxu1 }
 0x147   :  { %v705_v10 = vpop.f32.mrb[7].mxu0  ;;  %v702_v11 = vadd.f32 %v701_v2, %v589_v4  ;;  %v593_v12 = vadd.f32 %v592_v9, %v1325_v40  ;;  %973 = vmatprep.subr.bf16.mxu1 %v972_v3 }
 0x148   :  { %v704_v13 = vadd.f32 %v703_v6, %v591_v8  ;;  %975 = vmatpush1.bf16.xpose.msra.mxu1 %v974_v63  ;;  %v772_v15 = vmax.f32 %v700_v7, 0.0 }
 0x149   :  { %v706_v14 = vadd.f32 %v705_v10, %v593_v12  ;;  %v773_v17 = vmax.f32 %v702_v11, 0.0 }
 0x14a   :  { %v774_v16 = vmax.f32 %v704_v13, 0.0 }
 0x14b   :  { %v775_v18 = vmax.f32 %v706_v14, 0.0  ;;  %v596_v19 = vpop.f32.mrb[8].mxu1 }
 0x14c   :  { %v709_v20 = vpop.f32.mrb[8].mxu0  ;;  %v978_v21 = vpack.c.bf16 %v774_v16, %v772_v15  ;;  %v597_v22 = vadd.f32 %v596_v19, %v1323_v39  ;;  %v598_v23 = vpop.f32.mrb[9].mxu1 }
 0x14d   :  { %v711_v24 = vpop.f32.mrb[9].mxu0  ;;  %v976_v25 = vpack.c.bf16 %v775_v18, %v773_v17  ;;  %v599_v26 = vadd.f32 %v598_v23, %v1325_v40  ;;  %v600_v27 = vpop.f32.mrb[10].mxu1 }
 0x14e   :  { %v713_v28 = vpop.f32.mrb[10].mxu0  ;;  %v710_v29 = vadd.f32 %v709_v20, %v597_v22  ;;  %v601_v30 = vadd.f32 %v600_v27, %v1323_v39  ;;  %v602_v31 = vpop.f32.mrb[11].mxu1 }
 0x14f   :  { %v715_v32 = vpop.f32.mrb[11].mxu0  ;;  %v712_v34 = vadd.f32 %v711_v24, %v599_v26  ;;  %v603_v36 = vadd.f32 %v602_v31, %v1325_v40  ;;  %977 = vmatprep.subr.bf16.mxu1 %v976_v25 }
 0x150   :  { %v714_v38 = vadd.f32 %v713_v28, %v601_v30  ;;  %979 = vmatpush1.bf16.xpose.msra.mxu1 %v978_v21  ;;  %v776_v42 = vmax.f32 %v710_v29, 0.0 }
 0x151   :  { %v716_v41 = vadd.f32 %v715_v32, %v603_v36  ;;  %v777_v44 = vmax.f32 %v712_v34, 0.0 }
 0x152   :  { %v778_v43 = vmax.f32 %v714_v38, 0.0 }
 0x153   :  { %v779_v45 = vmax.f32 %v716_v41, 0.0  ;;  %v606_v46 = vpop.f32.mrb[12].mxu1 }
 0x154   :  { %v719_v47 = vpop.f32.mrb[12].mxu0  ;;  %v982_v48 = vpack.c.bf16 %v778_v43, %v776_v42  ;;  %v607_v49 = vadd.f32 %v606_v46, %v1323_v39  ;;  %v608_v50 = vpop.f32.mrb[13].mxu1 }
 0x155   :  { %v721_v51 = vpop.f32.mrb[13].mxu0  ;;  %v980_v52 = vpack.c.bf16 %v779_v45, %v777_v44  ;;  %v609_v53 = vadd.f32 %v608_v50, %v1325_v40  ;;  %v610_v54 = vpop.f32.mrb[14].mxu1 }
 0x156   :  { %v723_v55 = vpop.f32.mrb[14].mxu0  ;;  %v720_v56 = vadd.f32 %v719_v47, %v607_v49  ;;  %v611_v57 = vadd.f32 %v610_v54, %v1323_v39  ;;  %v612_v58 = vpop.f32.mrb[15].mxu1 }
 0x157   :  { %v725_v59 = vpop.f32.mrb[15].mxu0  ;;  %v722_v60 = vadd.f32 %v721_v51, %v609_v53  ;;  %v613_v61 = vadd.f32 %v612_v58, %v1325_v40  ;;  %981 = vmatprep.subr.bf16.mxu1 %v980_v52 }
 0x158   :  { %v724_v62 = vadd.f32 %v723_v55, %v611_v57  ;;  %983 = vmatpush1.bf16.xpose.msra.mxu1 %v982_v48  ;;  %v780_v0 = vmax.f32 %v720_v56, 0.0 }
 0x159   :  { %v726_v63 = vadd.f32 %v725_v59, %v613_v61  ;;  %v781_v2 = vmax.f32 %v722_v60, 0.0 }
 0x15a   :  { %v782_v1 = vmax.f32 %v724_v62, 0.0 }
 0x15b   :  { %v783_v3 = vmax.f32 %v726_v63, 0.0  ;;  %v616_v4 = vpop.f32.mrb[16].mxu1 }
 0x15c   :  { %v729_v5 = vpop.f32.mrb[16].mxu0  ;;  %v986_v6 = vpack.c.bf16 %v782_v1, %v780_v0  ;;  %v617_v7 = vadd.f32 %v616_v4, %v1323_v39  ;;  %v618_v8 = vpop.f32.mrb[17].mxu1 }
 0x15d   :  { %v731_v9 = vpop.f32.mrb[17].mxu0  ;;  %v984_v10 = vpack.c.bf16 %v783_v3, %v781_v2  ;;  %v619_v11 = vadd.f32 %v618_v8, %v1325_v40  ;;  %v620_v12 = vpop.f32.mrb[18].mxu1 }
 0x15e   :  { %v733_v13 = vpop.f32.mrb[18].mxu0  ;;  %v730_v14 = vadd.f32 %v729_v5, %v617_v7  ;;  %v621_v15 = vadd.f32 %v620_v12, %v1323_v39  ;;  %v622_v16 = vpop.f32.mrb[19].mxu1 }
 0x15f   :  { %v735_v17 = vpop.f32.mrb[19].mxu0  ;;  %v732_v18 = vadd.f32 %v731_v9, %v619_v11  ;;  %v623_v19 = vadd.f32 %v622_v16, %v1325_v40  ;;  %985 = vmatprep.subr.bf16.mxu1 %v984_v10 }
 0x160   :  { %v734_v20 = vadd.f32 %v733_v13, %v621_v15  ;;  %987 = vmatpush1.bf16.xpose.msra.mxu1 %v986_v6  ;;  %v784_v22 = vmax.f32 %v730_v14, 0.0 }
 0x161   :  { %v736_v21 = vadd.f32 %v735_v17, %v623_v19  ;;  %v785_v24 = vmax.f32 %v732_v18, 0.0 }
 0x162   :  { %v786_v23 = vmax.f32 %v734_v20, 0.0 }
 0x163   :  { %v787_v25 = vmax.f32 %v736_v21, 0.0  ;;  %v626_v26 = vpop.f32.mrb[20].mxu1 }
 0x164   :  { %v739_v27 = vpop.f32.mrb[20].mxu0  ;;  %v990_v28 = vpack.c.bf16 %v786_v23, %v784_v22  ;;  %v627_v29 = vadd.f32 %v626_v26, %v1323_v39  ;;  %v628_v30 = vpop.f32.mrb[21].mxu1 }
 0x165   :  { %v741_v31 = vpop.f32.mrb[21].mxu0  ;;  %v988_v32 = vpack.c.bf16 %v787_v25, %v785_v24  ;;  %v629_v34 = vadd.f32 %v628_v30, %v1325_v40  ;;  %v630_v36 = vpop.f32.mrb[22].mxu1 }
 0x166   :  { %v743_v38 = vpop.f32.mrb[22].mxu0  ;;  %v740_v41 = vadd.f32 %v739_v27, %v627_v29  ;;  %v631_v42 = vadd.f32 %v630_v36, %v1323_v39  ;;  %v632_v43 = vpop.f32.mrb[23].mxu1 }
 0x167   :  { %v745_v44 = vpop.f32.mrb[23].mxu0  ;;  %v742_v45 = vadd.f32 %v741_v31, %v629_v34  ;;  %v633_v46 = vadd.f32 %v632_v43, %v1325_v40  ;;  %989 = vmatprep.subr.bf16.mxu1 %v988_v32 }
 0x168   :  { %v744_v47 = vadd.f32 %v743_v38, %v631_v42  ;;  %991 = vmatpush1.bf16.xpose.msra.mxu1 %v990_v28  ;;  %v788_v49 = vmax.f32 %v740_v41, 0.0 }
 0x169   :  { %v746_v48 = vadd.f32 %v745_v44, %v633_v46  ;;  %v789_v51 = vmax.f32 %v742_v45, 0.0 }
 0x16a   :  { %v790_v50 = vmax.f32 %v744_v47, 0.0 }
 0x16b   :  { %v791_v52 = vmax.f32 %v746_v48, 0.0  ;;  %v636_v53 = vpop.f32.mrb[24].mxu1 }
 0x16c   :  { %v749_v54 = vpop.f32.mrb[24].mxu0  ;;  %v994_v55 = vpack.c.bf16 %v790_v50, %v788_v49  ;;  %v637_v56 = vadd.f32 %v636_v53, %v1323_v39  ;;  %v638_v57 = vpop.f32.mrb[25].mxu1 }
 0x16d   :  { %v751_v58 = vpop.f32.mrb[25].mxu0  ;;  %v992_v59 = vpack.c.bf16 %v791_v52, %v789_v51  ;;  %v639_v60 = vadd.f32 %v638_v57, %v1325_v40  ;;  %v640_v61 = vpop.f32.mrb[26].mxu1 }
 0x16e   :  { %v753_v62 = vpop.f32.mrb[26].mxu0  ;;  %v750_v63 = vadd.f32 %v749_v54, %v637_v56  ;;  %v641_v0 = vadd.f32 %v640_v61, %v1323_v39  ;;  %v642_v1 = vpop.f32.mrb[27].mxu1 }
 0x16f   :  { %v755_v2 = vpop.f32.mrb[27].mxu0  ;;  %v752_v3 = vadd.f32 %v751_v58, %v639_v60  ;;  %v643_v4 = vadd.f32 %v642_v1, %v1325_v40  ;;  %993 = vmatprep.subr.bf16.mxu1 %v992_v59 }
 0x170   :  { %v754_v5 = vadd.f32 %v753_v62, %v641_v0  ;;  %995 = vmatpush1.bf16.xpose.msra.mxu1 %v994_v55  ;;  %v792_v7 = vmax.f32 %v750_v63, 0.0 }
 0x171   :  { %v756_v6 = vadd.f32 %v755_v2, %v643_v4  ;;  %v793_v9 = vmax.f32 %v752_v3, 0.0 }
 0x172   :  { %v794_v8 = vmax.f32 %v754_v5, 0.0 }
 0x173   :  { %v795_v10 = vmax.f32 %v756_v6, 0.0  ;;  %v646_v11 = vpop.f32.mrb[28].mxu1 }
 0x174   :  { %v759_v12 = vpop.f32.mrb[28].mxu0  ;;  %v998_v13 = vpack.c.bf16 %v794_v8, %v792_v7  ;;  %v647_v14 = vadd.f32 %v646_v11, %v1323_v39  ;;  %v648_v15 = vpop.f32.mrb[29].mxu1 }
 0x175   :  { %v761_v16 = vpop.f32.mrb[29].mxu0  ;;  %v996_v17 = vpack.c.bf16 %v795_v10, %v793_v9  ;;  %v649_v18 = vadd.f32 %v648_v15, %v1325_v40  ;;  %v650_v19 = vpop.f32.mrb[30].mxu1 }
 0x176   :  { %v763_v20 = vpop.f32.mrb[30].mxu0  ;;  %v760_v21 = vadd.f32 %v759_v12, %v647_v14  ;;  %v651_v22 = vadd.f32 %v650_v19, %v1323_v39  ;;  %v652_v23 = vpop.f32.mrb[31].mxu1  ;;  %v807_v39 = vrot.slane %v1314_v35, %v214_v37 }
 0x177   :  { %v765_v24 = vpop.f32.mrb[31].mxu0  ;;  %v762_v25 = vadd.f32 %v761_v16, %v649_v18  ;;  %v653_v26 = vadd.f32 %v652_v23, %v1325_v40  ;;  %997 = vmatprep.subr.bf16.mxu1 %v996_v17  ;;  %v802_v40 = vstv %s1381_s4 }
 0x178   :  { %v764_v27 = vadd.f32 %v763_v20, %v651_v22  ;;  %999 = vmatpush1.bf16.xpose.msra.mxu1 %v998_v13  ;;  %v796_v29 = vmax.f32 %v760_v21, 0.0 }
 0x179   :  { %v766_v28 = vadd.f32 %v765_v24, %v653_v26  ;;  %v797_v31 = vmax.f32 %v762_v25, 0.0 }
 0x17a   :  { %v798_v30 = vmax.f32 %v764_v27, 0.0 }
 0x17b   :  { %v799_v32 = vmax.f32 %v766_v28, 0.0 }
 0x17c   :  { %v1002_v34 = vpack.c.bf16 %v798_v30, %v796_v29 }
 0x17d   :  { %v1000_v36 = vpack.c.bf16 %v799_v32, %v797_v31 }
 0x17f   :  { %1001 = vmatprep.subr.bf16.mxu1 %v1000_v36 }
 0x180   :  { %1003 = vmatpush1.bf16.xpose.msra.mxu1 %v1002_v34 }
 0x187   :  { %879 = vmatmul.mubr.f32.vlgmr.msra.gmra.mrb[32].mxu1 %v807_v39 }
 0x25a   :  { %v880_v38 = vpop.f32.mrb[32].mxu1 }
 0x25b   :  { %v881_v41 = vadd.f32 %v880_v38, %v802_v40  ;;  %v882_v42 = vpop.f32.mrb[33].mxu1 }
 0x25d   :  { %v971_v43 = vmul.f32 -1.442695, %v881_v41 }
 0x25f   :  { %1171 = vpow2.f32 %v971_v43 }
 0x269   :  { %v1172_v44 = vpop.eup %1171 }
 0x26a   :  { %v887_v45 = vadd.f32 1.0, %v1172_v44 }
 0x26c   :  { %1173 = vrcp.f32 %v887_v45 }
 0x276   :  { %v1174_v46 = vpop.eup %1173 }
 0x277   :  { %890 = vst [vmem:[#allocation8] sm:$0x1] %v1174_v46 }
 0x278   :  { %1230 = shalt.err (!%p1227_p6)
}
 0x279   :  { %s1231_s28 = scalar_lea.hbm %s1382_s5, 16 }
 0x27a   :  { %p1232_p7 = scmp.ne.s32.totalorder %s1382_s5, %s1231_s28  ;;  %p1235_p8 = scmp.lt.u32.totalorder %s1231_s28, %s1382_s5 }
 0x27c   :  { %p1237_p9 = pnand %p1235_p8, %p1232_p7 }
 0x27e   :  { %1240 = shalt.err (!%p1237_p9)
}
 0x27f   :  { %900 = dma.vmem_to_hbm [thread:$0]  %s898_s24, 16, %s1382_s5, [#allocation5]  }
 0x280   :  { %1245 = dma.done.wait [#allocation5], 16  }
 0x281   :  { %1246 = vsyncadd [#allocation5], 4294967280 }
 0x282   :  { %904 = vsyncpa [#allocation4], 1 }
 0x283   :  { %905 = vsyncpa [#allocation7], 1 }
 0x284   :  { %906 = vsyncpa [#allocation5], 1 }

</bundles_post_ra>
